<compile_context>
chip_gen: v5e
topology: v5e:2x2
jax: 0.10.0
libtpu: 0.0.40
codegen_flags: <defaults>
</compile_context>

<pallas_src>
import jax
import jax.numpy as jnp
from jax.experimental import pallas as pl
from jax.experimental.pallas import tpu as pltpu

BN_EPS = 1e-5


def _round_up(n, m):
    return ((n + m - 1) // m) * m


# ----------------------------------------------------------------------------
# Kernel
# ----------------------------------------------------------------------------
def projector_kernel(x_ref, pm_ref, w1_ref, vecs_ref, w2t_hbm, o_ref,
                     h_acc, poo_scr, w2t_vmem, w2_sem):
    # x_ref:    [B, c_blk, H*W]    lane-dense input slab (channel tile ci)
    # pm_ref:   [p*p, H*W]         pooling matrix, 1/(hb*wb) folded in
    # w1_ref:   [p*p, c_blk, out_p] Linear1 weight slice for this channel tile
    # vecs_ref: [3, out_p]         rows = (gamma, beta, b2)
    # w2t_hbm:  [out_p, out_p]     Linear2 weight (pre-transposed), ANY/HBM
    # o_ref:    [B, out_p]
    # h_acc:    VMEM f32 [B, out_p]        pre-BN Linear1 accumulator
    # poo_scr:  VMEM f32 [B, p*p, c_blk]   pooled-feature staging buffer
    # w2t_vmem: VMEM f32 [out_p, out_p]    manual-prefetch destination
    # w2_sem:   DMA semaphore for the w2t prefetch
    ci = pl.program_id(0)
    first = ci == 0
    last = ci == pl.num_programs(0) - 1

    B, c_blk, HW = x_ref.shape
    nb = pm_ref.shape[0]                      # p*p pooling bins

    @pl.when(first)
    def _():
        h_acc[...] = jnp.zeros_like(h_acc)
        # w2 is only needed in the epilogue: prefetch it manually instead of
        # keeping it pipeline-resident (double-buffered) for the whole grid.
        pltpu.make_async_copy(w2t_hbm, w2t_vmem, w2_sem).start()

    # ---- adaptive average pooling on the MXU (batched over B) --------------
    xb = x_ref[...]
    pm = jnp.broadcast_to(pm_ref[...].astype(xb.dtype)[None], (B, nb, HW))
    # pooled[b, k, c] = mean over spatial bin k of x[b, c, :, :]
    poo_scr[...] = jnp.einsum("bkl,bcl->bkc", pm, xb,
                              preferred_element_type=jnp.float32)

    # ---- Linear1 partial sums (b1 intentionally dropped: it is exactly
    #      cancelled by the BatchNorm batch-mean subtraction below) ----------
    h = jnp.dot(poo_scr[:, 0, :], w1_ref[0],
                preferred_element_type=jnp.float32)
    for k in range(1, nb):                    # static, tiny loop over bins
        h = h + jnp.dot(poo_scr[:, k, :], w1_ref[k],
                        preferred_element_type=jnp.float32)
    h_acc[...] += h                           # single accumulator RMW / step

    # ---- epilogue: BatchNorm (batch stats) + ReLU + Linear2 -----------------
    @pl.when(last)
    def _():
        pltpu.make_async_copy(w2t_hbm, w2t_vmem, w2_sem).wait()
        hh = h_acc[...]                                       # [B, out_p]
        v = vecs_ref[...]                                     # [3, out_p]
        gamma, beta, b2 = v[0:1, :], v[1:2, :], v[2:3, :]
        mu = jnp.mean(hh, axis=0, keepdims=True)
        d = hh - mu
        var = jnp.mean(d * d, axis=0, keepdims=True)          # biased variance
        scale = gamma * jax.lax.rsqrt(var + BN_EPS)
        hn = jnp.maximum(d * scale + beta, 0.0)               # BN + ReLU
        out = jnp.dot(hn, w2t_vmem[...],
                      preferred_element_type=jnp.float32) + b2
        o_ref[...] = out.astype(o_ref.dtype)


# ----------------------------------------------------------------------------
# One-off weight preparation (hoist out of the hot path; call once and cache)
# ----------------------------------------------------------------------------
def prepare_projector(params, channels, height, width, pool_param,
                      x_dtype=jnp.float32):
    C, H, W, p = channels, height, width, pool_param
    assert H % p == 0 and W % p == 0, "uniform adaptive-pool bins only"
    hb, wb = H // p, W // p
    out_dim = params["w2"].shape[0]
    in_dim = C * p * p
    assert params["w1"].shape == (out_dim, in_dim)
    out_p = _round_up(out_dim, 128)           # lane-dense hidden/output width
    pad_o = out_p - out_dim

    # Pooling matrix: pmF[k, h*W + w] = 1/(hb*wb) iff (h//hb)*p + (w//wb) == k
    hs = jnp.arange(H)
    ws = jnp.arange(W)
    bin_id = ((hs[:, None] // hb) * p + (ws[None, :] // wb)).reshape(1, H * W)
    pmF = (bin_id == jnp.arange(p * p)[:, None]).astype(x_dtype)
    pmF = pmF * jnp.asarray(1.0 / (hb * wb), dtype=x_dtype)

    # Linear1 weight rearranged to [k = ph*p + pw, c, o], out_dim padded.
    # (b1 is deliberately not used: cancelled by the BN mean subtraction.)
    w1r = jnp.transpose(params["w1"].reshape(out_dim, C, p * p), (2, 1, 0))
    w1r = jnp.pad(w1r, ((0, 0), (0, 0), (0, pad_o))).astype(jnp.float32)

    vecs = jnp.stack([params["gamma"], params["beta"], params["b2"]])
    vecs = jnp.pad(vecs, ((0, 0), (0, pad_o))).astype(jnp.float32)

    w2t = jnp.pad(params["w2"].T, ((0, pad_o), (0, pad_o))).astype(jnp.float32)

    return dict(pmF=pmF, w1r=w1r, vecs=vecs, w2t=w2t,
                C=C, H=H, W=W, p=p, out_dim=out_dim, out_p=out_p)


# ----------------------------------------------------------------------------
# VMEM sizing helpers
# ----------------------------------------------------------------------------
def _vmem_bytes(B, c_blk, HW, nb, out_p, x_itemsize):
    x_blk = 2 * B * c_blk * HW * x_itemsize                  # double-buffered
    w1_blk = 2 * nb * c_blk * out_p * 4
    pm = 2 * _round_up(nb, 8) * _round_up(HW, 128) * x_itemsize
    vecs = 2 * 8 * out_p * 4
    h_acc = B * out_p * 4
    poo = B * _round_up(nb, 8) * c_blk * 4
    w2 = out_p * out_p * 4
    out = 2 * B * out_p * 4
    return x_blk + w1_blk + pm + vecs + h_acc + poo + w2 + out


def _pick_c_block(C, B, HW, nb, out_p, x_itemsize, budget):
    cands = [C] + sorted([c for c in range(8, C, 8) if C % c == 0],
                         reverse=True)
    for c in cands:
        if _vmem_bytes(B, c, HW, nb, out_p, x_itemsize) <= budget:
            return c
    return cands[-1]


# ----------------------------------------------------------------------------
# Forward wrapper
# ----------------------------------------------------------------------------
def projector_forward(x, prep, c_block=None,
                      vmem_budget_bytes=48 * 1024 * 1024):
    B, C, H, W = x.shape
    assert (C, H, W) == (prep["C"], prep["H"], prep["W"])
    p, out_dim, out_p = prep["p"], prep["out_dim"], prep["out_p"]
    HW = H * W
    nb = p * p

    if c_block is None:
        c_block = _pick_c_block(C, B, HW, nb, out_p, x.dtype.itemsize,
                                vmem_budget_bytes)
    assert C % c_block == 0 and (c_block == C or c_block % 8 == 0)
    n_cblk = C // c_block

    # Free, contiguous reshape only -- no staging copy / transpose of x in HBM.
    x3 = x.reshape(B, C, HW)

    est = _vmem_bytes(B, c_block, HW, nb, out_p, x.dtype.itemsize)
    vmem_limit = int(min(128 * 1024 * 1024, max(32 * 1024 * 1024, 2 * est)))

    flops = (2.0 * B * C * HW * nb             # MXU pooling (nb bin columns)
             + 2.0 * B * C * nb * out_p        # Linear1
             + 2.0 * B * out_p * out_p         # Linear2
             + 10.0 * B * out_p)               # BN + ReLU epilogue
    bytes_accessed = (x.size * x.dtype.itemsize
                      + 4 * (prep["w1r"].size + prep["w2t"].size
                             + prep["vecs"].size + B * out_p)
                      + prep["pmF"].size * prep["pmF"].dtype.itemsize)
    cost = pl.CostEstimate(flops=int(flops), transcendentals=int(out_p),
                           bytes_accessed=int(bytes_accessed))

    out_padded = pl.pallas_call(
        projector_kernel,
        out_shape=jax.ShapeDtypeStruct((B, out_p), jnp.float32),
        grid_spec=pltpu.PrefetchScalarGridSpec(
            num_scalar_prefetch=0,
            grid=(n_cblk,),                    # channel-tile reduction axis
            in_specs=[
                pl.BlockSpec((B, c_block, HW), lambda ci: (0, ci, 0)),
                pl.BlockSpec((nb, HW), lambda ci: (0, 0)),
                pl.BlockSpec((nb, c_block, out_p), lambda ci: (0, ci, 0)),
                pl.BlockSpec((3, out_p), lambda ci: (0, 0)),
                pl.BlockSpec(memory_space=pl.ANY),   # w2t: manual prefetch
            ],
            out_specs=pl.BlockSpec((B, out_p), lambda ci: (0, 0)),
            scratch_shapes=[
                pltpu.VMEM((B, out_p), jnp.float32),         # h_acc
                pltpu.VMEM((B, nb, c_block), jnp.float32),   # pooled staging
                pltpu.VMEM((out_p, out_p), jnp.float32),     # w2t staging
                pltpu.SemaphoreType.DMA(()),                 # w2t copy sem
            ],
        ),
        compiler_params=pltpu.CompilerParams(
            dimension_semantics=("arbitrary",),
            vmem_limit_bytes=vmem_limit),
        cost_estimate=cost,
    )(x3, prep["pmF"], prep["w1r"], prep["vecs"], prep["w2t"])

    return out_padded[:, :out_dim]


# ----------------------------------------------------------------------------
# Parameters / pure-JAX reference
# ----------------------------------------------------------------------------
def init_params(key, in_dim, out_dim):
    k1, k2, k3, k4 = jax.random.split(key, 4)
    lim1 = 1.0 / jnp.sqrt(in_dim)
    lim2 = 1.0 / jnp.sqrt(out_dim)
    return {
        "w1": jax.random.uniform(k1, (out_dim, in_dim), jnp.float32, -lim1, lim1),
        "b1": jax.random.uniform(k2, (out_dim,), jnp.float32, -lim1, lim1),
        "gamma": jnp.ones((out_dim,), jnp.float32),
        "beta": jnp.zeros((out_dim,), jnp.float32),
        "w2": jax.random.uniform(k3, (out_dim, out_dim), jnp.float32, -lim2, lim2),
        "b2": jax.random.uniform(k4, (out_dim,), jnp.float32, -lim2, lim2),
    }


def reference_forward(x, params, pool_param):
    """Pure-JAX reference mirroring the PyTorch forward (training-mode BN, with b1)."""
    B, C, H, W = x.shape
    p = pool_param
    xr = x.reshape(B, C, p, H // p, p, W // p)
    pooled = xr.mean(axis=(3, 5))                        # [B, C, p, p]
    feat = pooled.reshape(B, C * p * p)
    h = jnp.dot(feat, params["w1"].T,
                precision=jax.lax.Precision.HIGHEST) + params["b1"]
    mu = h.mean(axis=0, keepdims=True)
    var = ((h - mu) ** 2).mean(axis=0, keepdims=True)
    h = params["gamma"] * (h - mu) / jnp.sqrt(var + BN_EPS) + params["beta"]
    h = jnp.maximum(h, 0.0)
    return jnp.dot(h, params["w2"].T,
                   precision=jax.lax.Precision.HIGHEST) + params["b2"]


if __name__ == "__main__":
    B, C, H, W = 8, 8, 16, 16
    pool_param = 2
    in_dim = C * pool_param * pool_param   # 32
    out_dim = 32

    key = jax.random.PRNGKey(0)
    kx, kp = jax.random.split(key)
    x = jax.random.normal(kx, (B, C, H, W), dtype=jnp.float32)
    params = init_params(kp, in_dim, out_dim)

    # Weight prep is a one-off; cache `prep` across forward calls.
    prep = prepare_projector(params, C, H, W, pool_param, x_dtype=x.dtype)

    out = projector_forward(x, prep)
    out = jax.block_until_ready(out)

    ref = reference_forward(x, params, pool_param)
    assert out.shape == (B, out_dim)
    max_err = float(jnp.max(jnp.abs(out - ref)))
    assert jnp.allclose(out, ref, atol=2e-3, rtol=2e-3), (
        f"mismatch vs reference (max abs err {max_err})")

    print("KERNEL_OK")
</pallas_src>

<mosaic_0001>
module attributes {stable_mosaic.version = 11 : i64} {
  func.func @projector_kernel(%arg0: i32, %arg1: memref<8x8x256xf32, #tpu.memory_space<vmem>>, %arg2: memref<4x256xf32, #tpu.memory_space<vmem>>, %arg3: memref<4x8x128xf32, #tpu.memory_space<vmem>>, %arg4: memref<3x128xf32, #tpu.memory_space<vmem>>, %arg5: memref<128x128xf32, #tpu.memory_space<any>>, %arg6: memref<8x128xf32, #tpu.memory_space<vmem>>, %arg7: memref<8x128xf32, #tpu.memory_space<vmem>>, %arg8: memref<8x4x8xf32, #tpu.memory_space<vmem>>, %arg9: memref<128x128xf32, #tpu.memory_space<vmem>>, %arg10: memref<!tpu.dma_semaphore, #tpu.memory_space<semaphore_mem>>) attributes {dimension_semantics = [#tpu.dimension_semantics<arbitrary>], iteration_bounds = array<i64: 1>, scalar_prefetch = 0 : i64, scratch_operands = 4 : i64, tpu.core_type = #tpu.core_type<tc>, window_params = [{transform_indices = @transform_0, window_bounds = array<i64: 8, 8, 256>}, {pipeline_mode = #tpu.pipeline_mode<synchronous>, transform_indices = @transform_1, window_bounds = array<i64: 4, 256>}, {transform_indices = @transform_2, window_bounds = array<i64: 4, 8, 128>}, {pipeline_mode = #tpu.pipeline_mode<synchronous>, transform_indices = @transform_3, window_bounds = array<i64: 3, 128>}, {}, {pipeline_mode = #tpu.pipeline_mode<synchronous>, transform_indices = @transform_5, window_bounds = array<i64: 8, 128>}]} {
    %c0_i32 = arith.constant 0 : i32
    %0 = arith.cmpi eq, %arg0, %c0_i32 : i32
    %c0_i32_0 = arith.constant 0 : i32
    %1 = arith.cmpi eq, %arg0, %c0_i32_0 : i32
    %2 = arith.extui %0 : i1 to i32
    %c0_i32_1 = arith.constant 0 : i32
    %3 = arith.cmpi ne, %2, %c0_i32_1 : i32
    scf.if %3 {
      %cst_39 = arith.constant 0.000000e+00 : f32
      %39 = vector.broadcast %cst_39 : f32 to vector<8x128xf32>
      %c0_40 = arith.constant 0 : index
      %c0_41 = arith.constant 0 : index
      %40 = vector.load %arg7[%c0_40, %c0_41] : memref<8x128xf32, #tpu.memory_space<vmem>>, vector<8x128xf32>
      tpu.vector_store %arg7[%c0_40, %c0_41], %39 {strides = array<i32>} : memref<8x128xf32, #tpu.memory_space<vmem>>, vector<8x128xf32>,
      tpu.enqueue_dma source(%arg5 : memref<128x128xf32, #tpu.memory_space<any>>) target(%arg9 : memref<128x128xf32, #tpu.memory_space<vmem>>) target_semaphore(%arg10 : memref<!tpu.dma_semaphore, #tpu.memory_space<semaphore_mem>>)
    } else {
    }
    %c0 = arith.constant 0 : index
    %c0_2 = arith.constant 0 : index
    %c0_3 = arith.constant 0 : index
    %4 = vector.load %arg1[%c0, %c0_2, %c0_3] : memref<8x8x256xf32, #tpu.memory_space<vmem>>, vector<8x8x256xf32>
    %c0_4 = arith.constant 0 : index
    %c0_5 = arith.constant 0 : index
    %5 = vector.load %arg2[%c0_4, %c0_5] : memref<4x256xf32, #tpu.memory_space<vmem>>, vector<4x256xf32>
    %6 = vector.shape_cast %5 : vector<4x256xf32> to vector<1x4x256xf32>
    %7 = vector.shape_cast %6 : vector<1x4x256xf32> to vector<1x4x256xf32>
    %8 = vector.broadcast %7 : vector<1x4x256xf32> to vector<8x4x256xf32>
    "tpu.trace_start"() <{level = 10 : i32, message = "bkl,bcl->bkc"}> : () -> ()
    %cst = arith.constant dense<0.000000e+00> : vector<8x4x8xf32>
    %9 = tpu.matmul %8, %4, %cst {dimension_numbers = #tpu.dot_dimension_numbers<[2], [2], [1], [1], [0, 0, 0, 1, 1, 1], [0], [0]>} : vector<8x4x256xf32>, vector<8x8x256xf32>, vector<8x4x8xf32> -> vector<8x4x8xf32>
    "tpu.trace_stop"() : () -> ()
    %c0_6 = arith.constant 0 : index
    %c0_7 = arith.constant 0 : index
    %c0_8 = arith.constant 0 : index
    %10 = vector.load %arg8[%c0_6, %c0_7, %c0_8] : memref<8x4x8xf32, #tpu.memory_space<vmem>>, vector<8x4x8xf32>
    tpu.vector_store %arg8[%c0_6, %c0_7, %c0_8], %9 {strides = array<i32>} : memref<8x4x8xf32, #tpu.memory_space<vmem>>, vector<8x4x8xf32>,
    %c0_9 = arith.constant 0 : index
    %c0_10 = arith.constant 0 : index
    %c0_11 = arith.constant 0 : index
    %11 = vector.load %arg8[%c0_9, %c0_10, %c0_11] : memref<8x4x8xf32, #tpu.memory_space<vmem>>, vector<8x1x8xf32>
    %12 = vector.shape_cast %11 : vector<8x1x8xf32> to vector<8x8xf32>
    %c0_12 = arith.constant 0 : index
    %c0_13 = arith.constant 0 : index
    %c0_14 = arith.constant 0 : index
    %13 = vector.load %arg3[%c0_12, %c0_13, %c0_14] : memref<4x8x128xf32, #tpu.memory_space<vmem>>, vector<1x8x128xf32>
    %14 = vector.shape_cast %13 : vector<1x8x128xf32> to vector<8x128xf32>
    %cst_15 = arith.constant dense<0.000000e+00> : vector<8x128xf32>
    %15 = tpu.matmul %12, %14, %cst_15 {dimension_numbers = #tpu.dot_dimension_numbers<[1], [0], [0], [1], [0, 0, 1, 1], [], []>} : vector<8x8xf32>, vector<8x128xf32>, vector<8x128xf32> -> vector<8x128xf32>
    %c0_16 = arith.constant 0 : index
    %c1 = arith.constant 1 : index
    %c0_17 = arith.constant 0 : index
    %16 = vector.load %arg8[%c0_16, %c1, %c0_17] : memref<8x4x8xf32, #tpu.memory_space<vmem>>, vector<8x1x8xf32>
    %17 = vector.shape_cast %16 : vector<8x1x8xf32> to vector<8x8xf32>
    %c1_18 = arith.constant 1 : index
    %c0_19 = arith.constant 0 : index
    %c0_20 = arith.constant 0 : index
    %18 = vector.load %arg3[%c1_18, %c0_19, %c0_20] : memref<4x8x128xf32, #tpu.memory_space<vmem>>, vector<1x8x128xf32>
    %19 = vector.shape_cast %18 : vector<1x8x128xf32> to vector<8x128xf32>
    %cst_21 = arith.constant dense<0.000000e+00> : vector<8x128xf32>
    %20 = tpu.matmul %17, %19, %cst_21 {dimension_numbers = #tpu.dot_dimension_numbers<[1], [0], [0], [1], [0, 0, 1, 1], [], []>} : vector<8x8xf32>, vector<8x128xf32>, vector<8x128xf32> -> vector<8x128xf32>
    %21 = arith.addf %15, %20 : vector<8x128xf32>
    %c0_22 = arith.constant 0 : index
    %c2 = arith.constant 2 : index
    %c0_23 = arith.constant 0 : index
    %22 = vector.load %arg8[%c0_22, %c2, %c0_23] : memref<8x4x8xf32, #tpu.memory_space<vmem>>, vector<8x1x8xf32>
    %23 = vector.shape_cast %22 : vector<8x1x8xf32> to vector<8x8xf32>
    %c2_24 = arith.constant 2 : index
    %c0_25 = arith.constant 0 : index
    %c0_26 = arith.constant 0 : index
    %24 = vector.load %arg3[%c2_24, %c0_25, %c0_26] : memref<4x8x128xf32, #tpu.memory_space<vmem>>, vector<1x8x128xf32>
    %25 = vector.shape_cast %24 : vector<1x8x128xf32> to vector<8x128xf32>
    %cst_27 = arith.constant dense<0.000000e+00> : vector<8x128xf32>
    %26 = tpu.matmul %23, %25, %cst_27 {dimension_numbers = #tpu.dot_dimension_numbers<[1], [0], [0], [1], [0, 0, 1, 1], [], []>} : vector<8x8xf32>, vector<8x128xf32>, vector<8x128xf32> -> vector<8x128xf32>
    %27 = arith.addf %21, %26 : vector<8x128xf32>
    %c0_28 = arith.constant 0 : index
    %c3 = arith.constant 3 : index
    %c0_29 = arith.constant 0 : index
    %28 = vector.load %arg8[%c0_28, %c3, %c0_29] : memref<8x4x8xf32, #tpu.memory_space<vmem>>, vector<8x1x8xf32>
    %29 = vector.shape_cast %28 : vector<8x1x8xf32> to vector<8x8xf32>
    %c3_30 = arith.constant 3 : index
    %c0_31 = arith.constant 0 : index
    %c0_32 = arith.constant 0 : index
    %30 = vector.load %arg3[%c3_30, %c0_31, %c0_32] : memref<4x8x128xf32, #tpu.memory_space<vmem>>, vector<1x8x128xf32>
    %31 = vector.shape_cast %30 : vector<1x8x128xf32> to vector<8x128xf32>
    %cst_33 = arith.constant dense<0.000000e+00> : vector<8x128xf32>
    %32 = tpu.matmul %29, %31, %cst_33 {dimension_numbers = #tpu.dot_dimension_numbers<[1], [0], [0], [1], [0, 0, 1, 1], [], []>} : vector<8x8xf32>, vector<8x128xf32>, vector<8x128xf32> -> vector<8x128xf32>
    %33 = arith.addf %27, %32 : vector<8x128xf32>
    %c0_34 = arith.constant 0 : index
    %c0_35 = arith.constant 0 : index
    %34 = vector.load %arg7[%c0_34, %c0_35] : memref<8x128xf32, #tpu.memory_space<vmem>>, vector<8x128xf32>
    %35 = arith.addf %34, %33 : vector<8x128xf32>
    %c0_36 = arith.constant 0 : index
    %c0_37 = arith.constant 0 : index
    %36 = vector.load %arg7[%c0_36, %c0_37] : memref<8x128xf32, #tpu.memory_space<vmem>>, vector<8x128xf32>
    tpu.vector_store %arg7[%c0_36, %c0_37], %35 {strides = array<i32>} : memref<8x128xf32, #tpu.memory_space<vmem>>, vector<8x128xf32>,
    %37 = arith.extui %1 : i1 to i32
    %c0_i32_38 = arith.constant 0 : i32
    %38 = arith.cmpi ne, %37, %c0_i32_38 : i32
    scf.if %38 {
      tpu.wait_dma2 semaphore(%arg10 : memref<!tpu.dma_semaphore, #tpu.memory_space<semaphore_mem>>) src(%arg5 : memref<128x128xf32, #tpu.memory_space<any>>) dst(%arg9 : memref<128x128xf32, #tpu.memory_space<vmem>>)
      %c0_39 = arith.constant 0 : index
      %c0_40 = arith.constant 0 : index
      %39 = vector.load %arg7[%c0_39, %c0_40] : memref<8x128xf32, #tpu.memory_space<vmem>>, vector<8x128xf32>
      %c0_41 = arith.constant 0 : index
      %c0_42 = arith.constant 0 : index
      %40 = vector.load %arg4[%c0_41, %c0_42] : memref<3x128xf32, #tpu.memory_space<vmem>>, vector<3x128xf32>
      %41 = vector.extract_strided_slice %40 {offsets = [0, 0], sizes = [1, 128], strides = [1, 1]} : vector<3x128xf32> to vector<1x128xf32>
      %42 = vector.extract_strided_slice %40 {offsets = [1, 0], sizes = [1, 128], strides = [1, 1]} : vector<3x128xf32> to vector<1x128xf32>
      %43 = vector.extract_strided_slice %40 {offsets = [2, 0], sizes = [1, 128], strides = [1, 1]} : vector<3x128xf32> to vector<1x128xf32>
      %cst_43 = arith.constant dense<0.000000e+00> : vector<128xf32>
      %44 = vector.multi_reduction <add>, %39, %cst_43 [0] : vector<8x128xf32> to vector<128xf32>
      %45 = vector.shape_cast %44 : vector<128xf32> to vector<1x128xf32>
      %cst_44 = arith.constant 8.000000e+00 : f32
      %46 = vector.broadcast %cst_44 : f32 to vector<1x128xf32>
      %47 = arith.divf %45, %46 : vector<1x128xf32>
      %48 = vector.broadcast %47 : vector<1x128xf32> to vector<8x128xf32>
      %49 = arith.subf %39, %48 : vector<8x128xf32>
      %50 = arith.mulf %49, %49 : vector<8x128xf32>
      %cst_45 = arith.constant dense<0.000000e+00> : vector<128xf32>
      %51 = vector.multi_reduction <add>, %50, %cst_45 [0] : vector<8x128xf32> to vector<128xf32>
      %52 = vector.shape_cast %51 : vector<128xf32> to vector<1x128xf32>
      %cst_46 = arith.constant 8.000000e+00 : f32
      %53 = vector.broadcast %cst_46 : f32 to vector<1x128xf32>
      %54 = arith.divf %52, %53 : vector<1x128xf32>
      %cst_47 = arith.constant 9.99999974E-6 : f32
      %55 = vector.broadcast %cst_47 : f32 to vector<1x128xf32>
      %56 = arith.addf %54, %55 : vector<1x128xf32>
      %57 = math.rsqrt %56 : vector<1x128xf32>
      %58 = arith.mulf %41, %57 : vector<1x128xf32>
      %59 = vector.broadcast %58 : vector<1x128xf32> to vector<8x128xf32>
      %60 = arith.mulf %49, %59 : vector<8x128xf32>
      %61 = vector.broadcast %42 : vector<1x128xf32> to vector<8x128xf32>
      %62 = arith.addf %60, %61 : vector<8x128xf32>
      %cst_48 = arith.constant 0.000000e+00 : f32
      %63 = vector.broadcast %cst_48 : f32 to vector<8x128xf32>
      %64 = arith.maximumf %62, %63 : vector<8x128xf32>
      %c0_49 = arith.constant 0 : index
      %c0_50 = arith.constant 0 : index
      %65 = vector.load %arg9[%c0_49, %c0_50] : memref<128x128xf32, #tpu.memory_space<vmem>>, vector<128x128xf32>
      %cst_51 = arith.constant dense<0.000000e+00> : vector<8x128xf32>
      %66 = tpu.matmul %64, %65, %cst_51 {dimension_numbers = #tpu.dot_dimension_numbers<[1], [0], [0], [1], [0, 0, 1, 1], [], []>} : vector<8x128xf32>, vector<128x128xf32>, vector<8x128xf32> -> vector<8x128xf32>
      %67 = vector.broadcast %43 : vector<1x128xf32> to vector<8x128xf32>
      %68 = arith.addf %66, %67 : vector<8x128xf32>
      %c0_52 = arith.constant 0 : index
      %c0_53 = arith.constant 0 : index
      %69 = vector.load %arg6[%c0_52, %c0_53] : memref<8x128xf32, #tpu.memory_space<vmem>>, vector<8x128xf32>
      tpu.vector_store %arg6[%c0_52, %c0_53], %68 {strides = array<i32>} : memref<8x128xf32, #tpu.memory_space<vmem>>, vector<8x128xf32>,
    } else {
    }
    return
  }
  func.func @transform_0(%arg0: i32) -> (i32, i32, i32) {
    %c0_i32 = arith.constant 0 : i32
    %c0_i32_0 = arith.constant 0 : i32
    %c0_i32_1 = arith.constant 0 : i32
    return %c0_i32, %arg0, %c0_i32_0 : i32, i32, i32
  }
  func.func @transform_1(%arg0: i32) -> (i32, i32) {
    %c0_i32 = arith.constant 0 : i32
    %c0_i32_0 = arith.constant 0 : i32
    %c0_i32_1 = arith.constant 0 : i32
    return %c0_i32, %c0_i32_0 : i32, i32
  }
  func.func @transform_2(%arg0: i32) -> (i32, i32, i32) {
    %c0_i32 = arith.constant 0 : i32
    %c0_i32_0 = arith.constant 0 : i32
    %c0_i32_1 = arith.constant 0 : i32
    return %c0_i32, %arg0, %c0_i32_0 : i32, i32, i32
  }
  func.func @transform_3(%arg0: i32) -> (i32, i32) {
    %c0_i32 = arith.constant 0 : i32
    %c0_i32_0 = arith.constant 0 : i32
    %c0_i32_1 = arith.constant 0 : i32
    return %c0_i32, %c0_i32_0 : i32, i32
  }
  func.func @transform_5(%arg0: i32) -> (i32, i32) {
    %c0_i32 = arith.constant 0 : i32
    %c0_i32_0 = arith.constant 0 : i32
    %c0_i32_1 = arith.constant 0 : i32
    return %c0_i32, %c0_i32_0 : i32, i32
  }
}

</mosaic_0001>

<bundles_post_ra>
// kernel: tpu_custom_call.1
= control target key start
LH: loop header
LB: loop body
LE: loop exit
PB: predicated region body
PF: predicated region fallthrough
CT: control target
= control target key end

     0   :  { %10 = vsyncpa [#allocation7], 0  ;;  %s1105_s0 = inlined_call_operand.hbm [shape: f32[8,8,256], index: 0, kind: input, shape index: {}]   ;;  %s1106_s1 = inlined_call_operand.hbm [shape: f32[4,256], index: 1, kind: input, shape index: {}]   ;;  %s1107_s2 = inlined_call_operand.hbm [shape: f32[4,8,128], index: 2, kind: input, shape index: {}]   ;;  %s1108_s3 = inlined_call_operand.hbm [shape: f32[3,128], index: 3, kind: input, shape index: {}]   ;;  %s1109_s4 = inlined_call_operand.hbm [shape: f32[128,128], index: 4, kind: input, shape index: {}]   ;;  %s1110_s5 = inlined_call_operand.hbm [shape: f32[8,128], index: 5, kind: output, shape index: {}]  }
   0x1   :  { %11 = vsyncpa [#allocation10], 0 }
   0x2   :  { %12 = vsyncpa [#allocation13], 0  ;;  %s32_s20 = sshll.u32 %s1106_s1, 4  ;;  %s33_s20 = int_to_ptr.hbm [resolvable:$true] %s32_s20 }
   0x3   :  { %13 = vsyncpa [#allocation8], 0  ;;  %s996_s21 = smov [#allocation9]   ;;  %s18_s25 = sshll.u32 %s1105_s0, 4  ;;  %s19_s25 = int_to_ptr.hbm [resolvable:$true] %s18_s25 }
   0x4   :  { %s34_s22 = sshll.u32 %s996_s21, 4  ;;  %s997_s26 = smov [#allocation6]   ;;  %s35_s22 = int_to_ptr.vmem [resolvable:$true] %s34_s22 }
   0x5   :  { %37 = dma.hbm_to_vmem [thread:$0]  %s33_s20, 128, %s35_s22, [#allocation10]  }
   0x6   :  { %s20_s27 = sshll.u32 %s997_s26, 4  ;;  %s998_s28 = smov 256   ;;  %s21_s27 = int_to_ptr.vmem [resolvable:$true] %s20_s27 }
   0x7   :  { %s999_s29 = smov 16   ;;  %s42_s1 = sshll.u32 %s1107_s2, 4  ;;  %s43_s1 = int_to_ptr.hbm [resolvable:$true] %s42_s1 }
   0x8   :  { %26 = dma.hbm_to_vmem [thread:$0]  %s19_s25, 2048, %s21_s27, [#allocation7], %s998_s28, %s998_s28, %s999_s29  }
   0x9   :  { %s1000_s7 = smov [#allocation11]   ;;  %s56_s0 = sshll.u32 %s1108_s3, 4  ;;  %s57_s0 = int_to_ptr.hbm [resolvable:$true] %s56_s0 }
   0xa   :  { %s44_s8 = sshll.u32 %s1000_s7, 4  ;;  %s1001_s11 = smov 128   ;;  %s45_s8 = int_to_ptr.vmem [resolvable:$true] %s44_s8 }
   0xb   :  { %s1002_s12 = smov 8   ;;  %s1003_s13 = smov [#allocation12]  }
   0xc   :  { %50 = dma.hbm_to_vmem [thread:$0]  %s43_s1, 512, %s45_s8, [#allocation10], %s1001_s11, %s1001_s11, %s1002_s12  }
   0xd   :  { %s58_s14 = sshll.u32 %s1003_s13, 4  ;;  %s59_s14 = int_to_ptr.vmem [resolvable:$true] %s58_s14 }
   0xe   :  { %61 = dma.hbm_to_vmem [thread:$0]  %s57_s0, 64, %s59_s14, [#allocation13]  }
   0xf   :  { %986 = dma.done.wait [#allocation7], 2048  }
  0x10   :  { %987 = vsyncadd [#allocation7], 4294965248 }
  0x11   :  { %988 = dma.done.wait [#allocation10], 640  }
  0x12   :  { %989 = vsyncadd [#allocation10], 4294966656 }
  0x13   :  { %990 = dma.done.wait [#allocation13], 64  }
  0x14   :  { %991 = vsyncadd [#allocation13], 4294967232  ;;  %v98_v0 = vld [vmem:[#allocation6 + $0x10] sm:$0xff]  ;;  %v1049_v1 = vld [vmem:[#allocation9] sm:$0xff]  ;;  %vm474_vm0 = vcmask 60416   ;;  %vm511_vm1 = vcmask 1041409  }
  0x15   :  { %v96_v2 = vld [vmem:[#allocation6] sm:$0xff]  ;;  %179 = vmatpush.xpose.msra.mxu2 %v98_v0  ;;  %114 = vst [vmem:[#allocation1] ss:$2 sm:$0xff] %v1049_v1  ;;  %v99_v3 = vld [vmem:[#allocation6 + $0x18] sm:$0xff]  ;;  %v97_v5 = vld [vmem:[#allocation6 + $0x8] sm:$0xff]  ;;  %vm514_vm2 = vcmask 1042434  }
  0x16   :  { %134 = vmatpush.xpose.msra.mxu1 %v96_v2  ;;  %v100_v4 = vld [vmem:[#allocation6 + $0x20] sm:$0xff]  ;;  %199 = vmatpush.xpose.msra.mxu3 %v99_v3  ;;  %v103_v6 = vld [vmem:[#allocation6 + $0x38] sm:$0xff]  ;;  %v101_v7 = vld [vmem:[#allocation6 + $0x28] sm:$0xff]  ;;  %vm517_vm3 = vcmask 1043459   ;;  %vm520_vm4 = vcmask 1044484   ;;  %vm523_vm5 = vcmask 1045509  }
  0x17   :  { %v102_v10 = vld [vmem:[#allocation6 + $0x30] sm:$0xff]  ;;  %v104_v11 = vld [vmem:[#allocation6 + $0x40] sm:$0xff]  ;;  %v105_v12 = vld [vmem:[#allocation6 + $0x48] sm:$0xff]  ;;  %vm526_vm6 = vcmask 1046534   ;;  %vm529_vm7 = vcmask 1047559   ;;  %vm531_vm8 = vcmask 64512  }
  0x18   :  { %v108_v15 = vld [vmem:[#allocation6 + $0x60] sm:$0xff]  ;;  %v106_v16 = vld [vmem:[#allocation6 + $0x50] sm:$0xff]  ;;  %v109_v17 = vld [vmem:[#allocation6 + $0x68] sm:$0xff]  ;;  %s90_s15 = sshll.u32 %s1109_s4, 4  ;;  %s1004_s16 = smov [#allocation4]   ;;  %s91_s15 = int_to_ptr.hbm [resolvable:$true] %s90_s15 }
  0x19   :  { %224 = vmatpush.xpose.msrb.mxu2 %v100_v4  ;;  %404 = vmatpush.xpose.msra.mxu0 %v108_v15  ;;  %v107_v20 = vld [vmem:[#allocation6 + $0x58] sm:$0xff]  ;;  %v110_v21 = vld [vmem:[#allocation6 + $0x70] sm:$0xff]  ;;  %v662_v46 = vld [vmem:[#allocation11 + $0x18] sm:$0xff]  ;;  %s92_s17 = sshll.u32 %s1004_s16, 4  ;;  %s93_s17 = int_to_ptr.vmem [resolvable:$true] %s92_s17 }
  0x1a   :  { %154 = vmatpush.xpose.msrb.mxu1 %v97_v5  ;;  %289 = vmatpush.xpose.msrb.mxu3 %v103_v6  ;;  %v111_v24 = vld [vmem:[#allocation6 + $0x78] sm:$0xff]  ;;  %v501_v47 = vld [vmem:[#allocation11 + $0x8] sm:$0xff]  ;;  %v491_v48 = vld [vmem:[#allocation11] sm:$0xff]  ;;  %95 = dma.hbm_to_vmem [thread:$0]  %s91_s15, 2048, %s93_s17, [#allocation5] }
  0x1b   :  { %v607_v45 = vld [vmem:[#allocation11 + $0x10] sm:$0xff] }
  0x1c   :  { %v115_v8 = vld.sshfl [vmem:[#allocation1] sm:$0xff pattern:$0x75316420]  ;;  %v116_v9 = vld.sshfl [vmem:[#allocation1 + $0x8] sm:$0xff pattern:$0x75316420] }
  0x1d   :  { %159 = vst [vmem:[#allocation1] ss:$2 sm:$0xff] %v1049_v1  ;;  %135 = vmatmul.f32.vlgmr.msra.gmra.mxu1 %v115_v8  ;;  %549 = vmatpush.msrb.mxu0 %v501_v47 }
  0x1e   :  { %244 = vmatpush.xpose.msra.mxu1 %v101_v7 }
  0x24   :  { %v160_v13 = vld.sshfl [vmem:[#allocation1] sm:$0xff pattern:$0x75316420]  ;;  %v161_v14 = vld.sshfl [vmem:[#allocation1 + $0x8] sm:$0xff pattern:$0x75316420] }
  0x25   :  { %180 = vmatmul.f32.vlgmr.msra.gmra.mxu2 %v160_v13  ;;  %200 = vmatmul.f32.vlgmr.msra.gmra.mxu3 %v161_v14  ;;  %204 = vst [vmem:[#allocation1] ss:$2 sm:$0xff] %v1049_v1 }
  0x26   :  { %155 = vmatmul.f32.vlgmr.msrb.gmra.mxu1 %v116_v9  ;;  %269 = vmatpush.xpose.msra.mxu2 %v102_v10 }
  0x27   :  { %314 = vmatpush.xpose.msra.mxu3 %v104_v11  ;;  %334 = vmatpush.xpose.msrb.mxu1 %v105_v12 }
  0x2c   :  { %v205_v18 = vld.sshfl [vmem:[#allocation1] sm:$0xff pattern:$0x75316420]  ;;  %v206_v19 = vld.sshfl [vmem:[#allocation1 + $0x8] sm:$0xff pattern:$0x75316420] }
  0x2d   :  { %225 = vmatmul.f32.vlgmr.msrb.gmra.mxu2 %v205_v18  ;;  %249 = vst [vmem:[#allocation1] ss:$2 sm:$0xff] %v1049_v1 }
  0x2e   :  { %245 = vmatmul.f32.vlgmr.msra.gmra.mxu1 %v206_v19  ;;  %359 = vmatpush.xpose.msrb.mxu2 %v106_v16 }
  0x2f   :  { %424 = vmatpush.xpose.msra.mxu1 %v109_v17 }
  0x34   :  { %v250_v22 = vld.sshfl [vmem:[#allocation1] sm:$0xff pattern:$0x75316420]  ;;  %v251_v23 = vld.sshfl [vmem:[#allocation1 + $0x8] sm:$0xff pattern:$0x75316420] }
  0x35   :  { %270 = vmatmul.f32.vlgmr.msra.gmra.mxu2 %v250_v22  ;;  %290 = vmatmul.f32.vlgmr.msrb.gmra.mxu3 %v251_v23  ;;  %294 = vst [vmem:[#allocation1] ss:$2 sm:$0xff] %v1049_v1 }
  0x36   :  { %379 = vmatpush.xpose.msrb.mxu3 %v107_v20  ;;  %449 = vmatpush.xpose.msra.mxu2 %v110_v21 }
  0x3c   :  { %v295_v25 = vld.sshfl [vmem:[#allocation1] sm:$0xff pattern:$0x75316420]  ;;  %v296_v26 = vld.sshfl [vmem:[#allocation1 + $0x8] sm:$0xff pattern:$0x75316420] }
  0x3d   :  { %315 = vmatmul.f32.vlgmr.msra.gmra.mxu3 %v295_v25  ;;  %335 = vmatmul.f32.vlgmr.msrb.gmra.mxu1 %v296_v26  ;;  %339 = vst [vmem:[#allocation1] ss:$2 sm:$0xff] %v1049_v1 }
  0x3e   :  { %469 = vmatpush.xpose.msra.mxu3 %v111_v24  ;;  %593 = vmatpush.msrb.mxu1 %v491_v48 }
  0x44   :  { %v340_v27 = vld.sshfl [vmem:[#allocation1] sm:$0xff pattern:$0x75316420]  ;;  %v341_v28 = vld.sshfl [vmem:[#allocation1 + $0x8] sm:$0xff pattern:$0x75316420] }
  0x45   :  { %360 = vmatmul.f32.vlgmr.msrb.gmra.mxu2 %v340_v27  ;;  %380 = vmatmul.f32.vlgmr.msrb.gmra.mxu3 %v341_v28  ;;  %384 = vst [vmem:[#allocation1] ss:$2 sm:$0xff] %v1049_v1 }
  0x46   :  { %647 = vmatpush.msrb.mxu2 %v607_v45  ;;  %702 = vmatpush.msrb.mxu3 %v662_v46 }
  0x4c   :  { %v385_v29 = vld.sshfl [vmem:[#allocation1] sm:$0xff pattern:$0x75316420]  ;;  %v386_v30 = vld.sshfl [vmem:[#allocation1 + $0x8] sm:$0xff pattern:$0x75316420] }
  0x4d   :  { %405 = vmatmul.f32.vlgmr.msra.gmra.mxu0 %v385_v29  ;;  %425 = vmatmul.f32.vlgmr.msra.gmra.mxu1 %v386_v30  ;;  %429 = vst [vmem:[#allocation1] ss:$2 sm:$0xff] %v1049_v1 }
  0x54   :  { %v430_v31 = vld.sshfl [vmem:[#allocation1] sm:$0xff pattern:$0x75316420]  ;;  %v431_v32 = vld.sshfl [vmem:[#allocation1 + $0x8] sm:$0xff pattern:$0x75316420] }
  0x55   :  { %450 = vmatmul.f32.vlgmr.msra.gmra.mxu2 %v430_v31  ;;  %470 = vmatmul.f32.vlgmr.msra.gmra.mxu3 %v431_v32 }
  0x9a   :  { %v136_v33 = vpop.f32.mrf.mxu1 }
  0xa3   :  { %v156_v34 = vpop.f32.mrf.mxu1 }
  0xa4   :  { %v157_v35 = vadd.f32 %v156_v34, %v136_v33 }
  0xa6   :  { %475 = vst.msk [vmem:[#allocation3] sm:$0xf] %vm474_vm0, %v157_v35 }
  0xa8   :  { %v181_v36 = vpop.f32.mrf.mxu2  ;;  %v201_v37 = vpop.f32.mrf.mxu3 }
  0xa9   :  { %v202_v38 = vadd.f32 %v201_v37, %v181_v36 }
  0xab   :  { %476 = vst.msk [vmem:[#allocation3 + $0x4] sm:$0xf] %vm474_vm0, %v202_v38  ;;  %v246_v39 = vpop.f32.mrf.mxu1 }
  0xad   :  { %v492_v2 = vld [vmem:[#allocation3 + $0x1] sm:$0x1]  ;;  %v483_v3 = vld [vmem:[#allocation3] sm:$0x1]  ;;  %v598_v11 = vld [vmem:[#allocation3 + $0x2] sm:$0x1] }
  0xae   :  { %v653_v12 = vld [vmem:[#allocation3 + $0x3] sm:$0x1] }
  0xb0   :  { %v226_v40 = vpop.f32.mrf.mxu2 }
  0xb1   :  { %v247_v41 = vadd.f32 %v246_v39, %v226_v40 }
  0xb2   :  { %v493_v58 = vld [vmem:[#allocation3 + $0x5] sm:$0x1]  ;;  %v484_v59 = vld [vmem:[#allocation3 + $0x4] sm:$0x1]  ;;  %v599_v60 = vld [vmem:[#allocation3 + $0x6] sm:$0x1] }
  0xb3   :  { %477 = vst.msk [vmem:[#allocation3 + $0x8] sm:$0xf] %vm474_vm0, %v247_v41  ;;  %v654_v61 = vld [vmem:[#allocation3 + $0x7] sm:$0x1]  ;;  %v510_v63 = vrot.slane %v493_v58, 7  ;;  %v562_v1 = vrot.slane %v484_v59, 7 }
  0xb4   :  { %v616_v6 = vrot.slane %v599_v60, 7  ;;  %v671_v8 = vrot.slane %v654_v61, 7 }
  0xb5   :  { %v512_v13 = vsel %vm511_vm1, %v510_v63, %v492_v2  ;;  %v563_v15 = vsel %vm511_vm1, %v562_v1, %v483_v3 }
  0xb6   :  { %v617_v26 = vsel %vm511_vm1, %v616_v6, %v598_v11  ;;  %v672_v28 = vsel %vm511_vm1, %v671_v8, %v653_v12 }
  0xb8   :  { %v271_v42 = vpop.f32.mrf.mxu2  ;;  %v291_v43 = vpop.f32.mrf.mxu3 }
  0xb9   :  { %v292_v44 = vadd.f32 %v291_v43, %v271_v42 }
  0xba   :  { %v336_v49 = vpop.f32.mrf.mxu1  ;;  %v494_v62 = vld [vmem:[#allocation3 + $0x9] sm:$0x1]  ;;  %v485_v0 = vld [vmem:[#allocation3 + $0x8] sm:$0x1]  ;;  %v600_v4 = vld [vmem:[#allocation3 + $0xa] sm:$0x1] }
  0xbb   :  { %478 = vst.msk [vmem:[#allocation3 + $0xc] sm:$0xf] %vm474_vm0, %v292_v44  ;;  %v655_v7 = vld [vmem:[#allocation3 + $0xb] sm:$0x1]  ;;  %v513_v9 = vrot.slane %v494_v62, 6  ;;  %v564_v10 = vrot.slane %v485_v0, 6 }
  0xbc   :  { %v618_v17 = vrot.slane %v600_v4, 6  ;;  %v673_v21 = vrot.slane %v655_v7, 6 }
  0xbd   :  { %v515_v31 = vsel %vm514_vm2, %v513_v9, %v512_v13  ;;  %v565_v33 = vsel %vm514_vm2, %v564_v10, %v563_v15 }
  0xbe   :  { %v619_v40 = vsel %vm514_vm2, %v618_v17, %v617_v26  ;;  %v674_v43 = vsel %vm514_vm2, %v673_v21, %v672_v28 }
  0xc0   :  { %v316_v50 = vpop.f32.mrf.mxu3 }
  0xc1   :  { %v337_v51 = vadd.f32 %v336_v49, %v316_v50 }
  0xc2   :  { %v495_v5 = vld [vmem:[#allocation3 + $0xd] sm:$0x1]  ;;  %v486_v14 = vld [vmem:[#allocation3 + $0xc] sm:$0x1]  ;;  %v601_v16 = vld [vmem:[#allocation3 + $0xe] sm:$0x1] }
  0xc3   :  { %479 = vst.msk [vmem:[#allocation3 + $0x10] sm:$0xf] %vm474_vm0, %v337_v51  ;;  %v516_v19 = vrot.slane %v495_v5, 5  ;;  %v656_v20 = vld [vmem:[#allocation3 + $0xf] sm:$0x1]  ;;  %v566_v36 = vrot.slane %v486_v14, 5 }
  0xc4   :  { %v620_v37 = vrot.slane %v601_v16, 5  ;;  %v675_v38 = vrot.slane %v656_v20, 5 }
  0xc5   :  { %v518_v51 = vsel %vm517_vm3, %v516_v19, %v515_v31 }
  0xc6   :  { %v676_v59 = vsel %vm517_vm3, %v675_v38, %v674_v43 }
  0xc8   :  { %v361_v52 = vpop.f32.mrf.mxu2  ;;  %v381_v53 = vpop.f32.mrf.mxu3 }
  0xc9   :  { %v382_v54 = vadd.f32 %v381_v53, %v361_v52  ;;  %v567_v52 = vsel %vm517_vm3, %v566_v36, %v565_v33  ;;  %v621_v53 = vsel %vm517_vm3, %v620_v37, %v619_v40 }
  0xca   :  { %v406_v55 = vpop.f32.mrf.mxu0  ;;  %v426_v56 = vpop.f32.mrf.mxu1  ;;  %v496_v18 = vld [vmem:[#allocation3 + $0x11] sm:$0x1]  ;;  %v487_v24 = vld [vmem:[#allocation3 + $0x10] sm:$0x1]  ;;  %v602_v25 = vld [vmem:[#allocation3 + $0x12] sm:$0x1] }
  0xcb   :  { %480 = vst.msk [vmem:[#allocation3 + $0x14] sm:$0xf] %vm474_vm0, %v382_v54  ;;  %v427_v57 = vadd.f32 %v426_v56, %v406_v55  ;;  %v657_v27 = vld [vmem:[#allocation3 + $0x13] sm:$0x1]  ;;  %v519_v35 = vrot.slane %v496_v18, 4  ;;  %v568_v39 = vrot.slane %v487_v24, 4 }
  0xcc   :  { %v622_v41 = vrot.slane %v602_v25, 4  ;;  %v677_v47 = vrot.slane %v657_v27, 4 }
  0xcd   :  { %481 = vst.msk [vmem:[#allocation3 + $0x18] sm:$0xf] %vm474_vm0, %v427_v57  ;;  %v521_v56 = vsel %vm520_vm4, %v519_v35, %v518_v51  ;;  %v569_v57 = vsel %vm520_vm4, %v568_v39, %v567_v52 }
  0xce   :  { %v623_v58 = vsel %vm520_vm4, %v622_v41, %v621_v53  ;;  %v678_v63 = vsel %vm520_vm4, %v677_v47, %v676_v59 }
  0xd2   :  { %v497_v30 = vld [vmem:[#allocation3 + $0x15] sm:$0x1]  ;;  %v488_v32 = vld [vmem:[#allocation3 + $0x14] sm:$0x1]  ;;  %v603_v34 = vld [vmem:[#allocation3 + $0x16] sm:$0x1] }
  0xd3   :  { %v658_v42 = vld [vmem:[#allocation3 + $0x17] sm:$0x1]  ;;  %v522_v44 = vrot.slane %v497_v30, 3  ;;  %v570_v45 = vrot.slane %v488_v32, 3  ;;  %v624_v46 = vrot.slane %v603_v34, 3 }
  0xd4   :  { %v498_v48 = vld [vmem:[#allocation3 + $0x19] sm:$0x1]  ;;  %v489_v49 = vld [vmem:[#allocation3 + $0x18] sm:$0x1]  ;;  %v604_v50 = vld [vmem:[#allocation3 + $0x1a] sm:$0x1] }
  0xd5   :  { %v659_v54 = vld [vmem:[#allocation3 + $0x1b] sm:$0x1]  ;;  %v679_v55 = vrot.slane %v658_v42, 3  ;;  %v525_v60 = vrot.slane %v498_v48, 2  ;;  %v572_v61 = vrot.slane %v489_v49, 2  ;;  %v626_v62 = vrot.slane %v604_v50, 2 }
  0xd6   :  { %v524_v0 = vsel %vm523_vm5, %v522_v44, %v521_v56  ;;  %v571_v1 = vsel %vm523_vm5, %v570_v45, %v569_v57  ;;  %v625_v2 = vsel %vm523_vm5, %v624_v46, %v623_v58  ;;  %v681_v3 = vrot.slane %v659_v54, 2 }
  0xd7   :  { %v680_v7 = vsel %vm523_vm5, %v679_v55, %v678_v63  ;;  %v527_v12 = vsel %vm526_vm6, %v525_v60, %v524_v0  ;;  %v573_v13 = vsel %vm526_vm6, %v572_v61, %v571_v1  ;;  %v627_v14 = vsel %vm526_vm6, %v626_v62, %v625_v2 }
  0xd8   :  { %v451_v22 = vpop.f32.mrf.mxu2  ;;  %v471_v23 = vpop.f32.mrf.mxu3  ;;  %v682_v19 = vsel %vm526_vm6, %v681_v3, %v680_v7 }
  0xd9   :  { %v472_v29 = vadd.f32 %v471_v23, %v451_v22 }
  0xdb   :  { %482 = vst.msk [vmem:[#allocation3 + $0x1c] sm:$0xf] %vm474_vm0, %v472_v29 }
  0xe2   :  { %v499_v4 = vld [vmem:[#allocation3 + $0x1d] sm:$0x1]  ;;  %v490_v5 = vld [vmem:[#allocation3 + $0x1c] sm:$0x1]  ;;  %v605_v6 = vld [vmem:[#allocation3 + $0x1e] sm:$0x1] }
  0xe3   :  { %v528_v8 = vrot.slane %v499_v4, 1  ;;  %v574_v9 = vrot.slane %v490_v5, 1  ;;  %v628_v10 = vrot.slane %v605_v6, 1  ;;  %v660_v11 = vld [vmem:[#allocation3 + $0x1f] sm:$0x1] }
  0xe4   :  { %v683_v15 = vrot.slane %v660_v11, 1 }
  0xe5   :  { %v530_v16 = vsel %vm529_vm7, %v528_v8, %v527_v12  ;;  %v575_v17 = vsel %vm529_vm7, %v574_v9, %v573_v13  ;;  %v629_v18 = vsel %vm529_vm7, %v628_v10, %v627_v14 }
  0xe6   :  { %822 = vmatmul.msk.f32.vlgmr.msrb.gmra.mxu0 %vm531_vm8, %v530_v16  ;;  %823 = vmatmul.msk.f32.vlgmr.msrb.gmra.mxu1 %vm531_vm8, %v575_v17  ;;  %v684_v20 = vsel %vm529_vm7, %v683_v15, %v682_v19 }
  0xe7   :  { %824 = vmatmul.msk.f32.vlgmr.msrb.gmra.mxu2 %vm531_vm8, %v629_v18  ;;  %825 = vmatmul.msk.f32.vlgmr.msrb.gmra.mxu3 %vm531_vm8, %v684_v20 }
 0x163   :  { %v551_v21 = vpop.f32.mrf.mxu0  ;;  %v595_v22 = vpop.f32.mrf.mxu1 }
 0x164   :  { %v596_v23 = vadd.f32 %v595_v22, %v551_v21 }
 0x16a   :  { %v649_v24 = vpop.f32.mrf.mxu2  ;;  %v704_v26 = vpop.f32.mrf.mxu3 }
 0x16b   :  { %v652_v25 = vadd.f32 %v649_v24, %v596_v23 }
 0x16d   :  { %v707_v27 = vadd.f32 %v704_v26, %v652_v25 }
 0x16e   :  { %992 = dma.done.wait [#allocation5], 2048 }
 0x16f   :  { %993 = vsyncadd [#allocation5], 4294965248  ;;  %v719_v28 = vrot.slane %v707_v27, 4  ;;  %v1005_v29 = vmov 8.0   ;;  %v774_v34 = vld [vmem:[#allocation4 + $0x78] sm:$0xff]  ;;  %v773_v35 = vld [vmem:[#allocation4 + $0x70] sm:$0xff] }
 0x170   :  { %838 = vrcp.f32 %v1005_v29  ;;  %776 = vmatpush.msra.mxu0 %v774_v34  ;;  %v772_v37 = vld [vmem:[#allocation4 + $0x68] sm:$0xff]  ;;  %v771_v40 = vld [vmem:[#allocation4 + $0x60] sm:$0xff]  ;;  %v770_v42 = vld [vmem:[#allocation4 + $0x58] sm:$0xff]  ;;  %s1006_s4 = smov [#allocation14]   ;;  %s804_s21 = sshll.u32 %s1110_s5, 4  ;;  %s805_s21 = int_to_ptr.hbm [resolvable:$true] %s804_s21 }
 0x171   :  { %v720_v30 = vadd.f32 %v719_v28, %v707_v27  ;;  %v769_v45 = vld [vmem:[#allocation4 + $0x50] sm:$0xff]  ;;  %v768_v47 = vld [vmem:[#allocation4 + $0x48] sm:$0xff]  ;;  %v767_v49 = vld [vmem:[#allocation4 + $0x40] sm:$0xff]  ;;  %s802_s18 = sshll.u32 %s1006_s4, 4  ;;  %s803_s18 = int_to_ptr.vmem [resolvable:$true] %s802_s18 }
 0x172   :  { %777 = vmatpush.msra.mxu0 %v773_v35  ;;  %v766_v51 = vld [vmem:[#allocation4 + $0x38] sm:$0xff]  ;;  %v765_v53 = vld [vmem:[#allocation4 + $0x30] sm:$0xff]  ;;  %v764_v55 = vld [vmem:[#allocation4 + $0x28] sm:$0xff] }
 0x173   :  { %v721_v31 = vrot.slane %v720_v30, 2  ;;  %v763_v57 = vld [vmem:[#allocation4 + $0x20] sm:$0xff]  ;;  %v762_v59 = vld [vmem:[#allocation4 + $0x18] sm:$0xff]  ;;  %v761_v61 = vld [vmem:[#allocation4 + $0x10] sm:$0xff] }
 0x174   :  { %778 = vmatpush.msra.mxu0 %v772_v37  ;;  %v760_v63 = vld [vmem:[#allocation4 + $0x8] sm:$0xff]  ;;  %v759_v1 = vld [vmem:[#allocation4] sm:$0xff] }
 0x175   :  { %v722_v32 = vadd.f32 %v721_v31, %v720_v30  ;;  %v718_v9 = vld [vmem:[#allocation12] sm:$0x7] }
 0x176   :  { %v839_v33 = vpop.eup %838  ;;  %779 = vmatpush.msra.mxu0 %v771_v40  ;;  %v756_v14 = vperm.slane %v718_v9, 1  ;;  %v775_v18 = vperm.slane %v718_v9, 2 }
 0x177   :  { %v726_v36 = vmul.f32 8.0, %v839_v33  ;;  %v723_v38 = vrot.slane %v722_v32, 1  ;;  %vm730_vm9 = vweird.f32 %v839_v33 }
 0x178   :  { %780 = vmatpush.msra.mxu0 %v770_v42 }
 0x179   :  { %v727_v39 = vsub.f32 1.0, %v726_v36  ;;  %v724_v43 = vadd.f32 %v723_v38, %v722_v32 }
 0x17a   :  { %781 = vmatpush.msra.mxu0 %v769_v45 }
 0x17b   :  { %v728_v41 = vmul.f32 %v839_v33, %v727_v39 }
 0x17c   :  { %782 = vmatpush.msra.mxu0 %v768_v47 }
 0x17d   :  { %v729_v44 = vadd.f32 %v839_v33, %v728_v41 }
 0x17e   :  { %783 = vmatpush.msra.mxu0 %v767_v49 }
 0x17f   :  { %v731_v46 = vsel %vm730_vm9, %v839_v33, %v729_v44 }
 0x180   :  { %v732_v48 = vmul.f32 %v731_v46, %v724_v43  ;;  %784 = vmatpush.msra.mxu0 %v766_v51 }
 0x182   :  { %v733_v50 = vsub.f32 %v707_v27, %v732_v48  ;;  %785 = vmatpush.msra.mxu0 %v765_v53 }
 0x184   :  { %v734_v52 = vmul.f32 %v733_v50, %v733_v50  ;;  %786 = vmatpush.msra.mxu0 %v764_v55 }
 0x186   :  { %v735_v54 = vrot.slane %v734_v52, 4  ;;  %787 = vmatpush.msra.mxu0 %v763_v57 }
 0x188   :  { %v736_v56 = vadd.f32 %v735_v54, %v734_v52  ;;  %788 = vmatpush.msra.mxu0 %v762_v59 }
 0x18a   :  { %v737_v58 = vrot.slane %v736_v56, 2  ;;  %789 = vmatpush.msra.mxu0 %v761_v61 }
 0x18c   :  { %v738_v60 = vadd.f32 %v737_v58, %v736_v56  ;;  %790 = vmatpush.msra.mxu0 %v760_v63 }
 0x18e   :  { %v739_v62 = vrot.slane %v738_v60, 1  ;;  %791 = vmatpush.msra.mxu0 %v759_v1 }
 0x190   :  { %v740_v0 = vadd.f32 %v739_v62, %v738_v60 }
 0x192   :  { %v741_v2 = vmul.f32 %v740_v0, %v731_v46 }
 0x194   :  { %v742_v3 = vadd.f32 1e-05, %v741_v2 }
 0x196   :  { %840 = vrsqrt.f32 %v742_v3  ;;  %vm749_vm10 = vweird.f32 %v742_v3 }
 0x19c   :  { %v841_v4 = vpop.eup %840 }
 0x19d   :  { %v744_v5 = vmul.f32 %v841_v4, %v742_v3  ;;  %vm750_vm11 = vweird.f32 %v841_v4 }
 0x19e   :  { %vm751_vm12 = vmor %vm749_vm10, %vm750_vm11 }
 0x19f   :  { %v745_v6 = vmul.f32 %v841_v4, %v744_v5 }
 0x1a1   :  { %v746_v7 = vmul.f32 0.5, %v745_v6 }
 0x1a3   :  { %v747_v8 = vsub.f32 1.5, %v746_v7 }
 0x1a5   :  { %v748_v10 = vmul.f32 %v841_v4, %v747_v8 }
 0x1a7   :  { %v752_v11 = vsel %vm751_vm12, %v841_v4, %v748_v10 }
 0x1a8   :  { %v753_v12 = vmul.f32 %v752_v11, %v718_v9 }
 0x1aa   :  { %v754_v13 = vperm.slane %v753_v12, 0 }
 0x1ac   :  { %v755_v15 = vmul.f32 %v754_v13, %v733_v50 }
 0x1ae   :  { %v757_v16 = vadd.f32 %v756_v14, %v755_v15 }
 0x1b0   :  { %v758_v17 = vmax.f32 %v757_v16, 0.0 }
 0x1b2   :  { %792 = vmatmul.f32.vlgmr.msra.gmra.mxu0 %v758_v17 }
 0x22f   :  { %v793_v19 = vpop.f32.mrf.mxu0 }
 0x230   :  { %v794_v20 = vadd.f32 %v793_v19, %v775_v18 }
 0x232   :  { %796 = vst [vmem:[#allocation14] sm:$0xff] %v794_v20 }
 0x233   :  { %807 = dma.vmem_to_hbm [thread:$0]  %s803_s18, 128, %s805_s21, [#allocation8]  }
 0x234   :  { %994 = dma.done.wait [#allocation8], 128  }
 0x235   :  { %995 = vsyncadd [#allocation8], 4294967168 }
 0x236   :  { %812 = vsyncpa [#allocation7], 1 }
 0x237   :  { %813 = vsyncpa [#allocation10], 1 }
 0x238   :  { %814 = vsyncpa [#allocation13], 1 }
 0x239   :  { %815 = vsyncpa [#allocation8], 1 }
 0x23a   :  { %816 = vsyncmov [#allocation5] }
 0x23d   :  { %s817_s22 = vpop.sfrf %816 }
 0x23e   :  { %p826_p0 = scmp.ne.s32.totalorder %s817_s22, 0 }
 0x240   :  { %821 = shalt.err (%p826_p0)  }

</bundles_post_ra>
